<compile_context>
chip_gen: v7x
topology: tpu7x:2x2x1
jax: 0.10.0
libtpu: 0.0.40
codegen_flags: <defaults>
</compile_context>

<pallas_src>
import jax
import jax.numpy as jnp
from jax.experimental import pallas as pl
from jax.experimental.pallas import tpu as pltpu


def _se_block_kernel(x_ref, w1_ref, b1_ref, w2_ref, b2_ref, o_ref):
    """Fused SE block for one sample.

    x_ref : (C, H*W)  feature-map slab (lane-dense, H*W a multiple of 128)
    w1_ref: (C, Cr)   squeeze FC weight   (h = relu(s @ w1 + b1))
    b1_ref: (1, Cr)
    w2_ref: (C, Cr)   excite  FC weight   (z = sigmoid(h @ w2.T + b2))
    b2_ref: (C, 1)
    o_ref : (C, H*W)  rescaled feature map
    """
    x = x_ref[...]                                           # (C, HW) f32

    # Squeeze: global average pool over spatial (lane-axis reduce -> XLU).
    s = jnp.mean(x, axis=-1, keepdims=True)                  # (C, 1)

    # Excitation FC1 + ReLU: contraction over C along the sublane axis.
    h = jnp.sum(w1_ref[...] * s, axis=0, keepdims=True) + b1_ref[...]   # (1, Cr)
    h = jnp.maximum(h, 0.0)

    # Excitation FC2 + sigmoid: contraction over Cr along the lane axis.
    z = jnp.sum(w2_ref[...] * h, axis=-1, keepdims=True) + b2_ref[...]  # (C, 1)
    z = 1.0 / (1.0 + jnp.exp(-z))                            # sigmoid on the EUP

    # Scale: channel-wise rescale of the feature map (VPU broadcast multiply).
    o_ref[...] = (x * z).astype(o_ref.dtype)


def se_block_pallas(x_nchw, w1, b1, w2, b2):
    """y = x * sigmoid(relu(mean_hw(x) @ w1 + b1) @ w2.T + b2), fused in one kernel."""
    N, C, H, W = x_nchw.shape
    HW = H * W
    Cr = w1.shape[1]
    x3d = x_nchw.reshape(N, C, HW)    # lane-dense slab: last dim multiple of 128

    out3d = pl.pallas_call(
        _se_block_kernel,
        out_shape=jax.ShapeDtypeStruct((N, C, HW), x_nchw.dtype),
        grid_spec=pltpu.PrefetchScalarGridSpec(
            num_scalar_prefetch=0,
            grid=(N,),                # batch axis; "parallel" lets v7x's 2 TCs split it
            in_specs=[
                pl.BlockSpec((None, C, HW), lambda n: (n, 0, 0)),   # per-sample slab
                pl.BlockSpec((C, Cr), lambda n: (0, 0)),            # w1 (full array)
                pl.BlockSpec((1, Cr), lambda n: (0, 0)),            # b1
                pl.BlockSpec((C, Cr), lambda n: (0, 0)),            # w2
                pl.BlockSpec((C, 1), lambda n: (0, 0)),             # b2
            ],
            out_specs=pl.BlockSpec((None, C, HW), lambda n: (n, 0, 0)),
        ),
        compiler_params=pltpu.CompilerParams(
            dimension_semantics=("parallel",),
        ),
    )(x3d, w1, b1, w2, b2)
    return out3d.reshape(N, C, H, W)


def _se_block_ref(x, w1, b1, w2, b2):
    """Pure-JAX reference for the fused SE kernel."""
    s = x.mean(axis=(2, 3))                                  # (N, C)
    h = jnp.maximum(s @ w1 + b1.reshape(1, -1), 0.0)         # (N, Cr)
    z = 1.0 / (1.0 + jnp.exp(-(h @ w2.T + b2.reshape(1, -1))))   # (N, C)
    return x * z[:, :, None, None]


class SENetPallas:
    """Pallas port of DLLab3/model/SENet.py::SENet."""

    def __init__(self):
        # Reference __init__ registers nothing -> no parameters to build.
        pass

    def forward(self):
        # Reference forward body is `pass` -> returns None, takes no inputs.
        return None


if __name__ == "__main__":
    # Deterministic example input (NCHW) and SE-block parameters.
    N, C, H, W = 2, 4, 16, 16
    Cr = C // 2                        # reduction ratio r = 2
    key = jax.random.PRNGKey(0)
    kx, k1, k2, k3, k4 = jax.random.split(key, 5)
    x = jax.random.normal(kx, (N, C, H, W), dtype=jnp.float32)
    w1 = jax.random.normal(k1, (C, Cr), dtype=jnp.float32) * 0.5
    b1 = jax.random.normal(k2, (1, Cr), dtype=jnp.float32) * 0.1
    w2 = jax.random.normal(k3, (C, Cr), dtype=jnp.float32) * 0.5
    b2 = jax.random.normal(k4, (C, 1), dtype=jnp.float32) * 0.1

    # Run the fused Pallas SE-block kernel once and verify against pure JAX.
    y = se_block_pallas(x, w1, b1, w2, b2)
    jax.block_until_ready(y)
    y_ref = _se_block_ref(x, w1, b1, w2, b2)
    assert bool(jnp.allclose(y, y_ref, rtol=1e-5, atol=1e-5)), "SE-block mismatch"

    # Exercise the module exactly as PyTorch would: forward() -> None.
    model = SENetPallas()
    out = model.forward()
    assert out is None

    print("KERNEL_OK")
</pallas_src>

<mosaic_0001>
module attributes {stable_mosaic.version = 11 : i64} {
  func.func @_se_block_kernel(%arg0: i32, %arg1: memref<1x4x256xf32, #tpu.memory_space<vmem>>, %arg2: memref<4x2xf32, #tpu.memory_space<vmem>>, %arg3: memref<1x2xf32, #tpu.memory_space<vmem>>, %arg4: memref<4x2xf32, #tpu.memory_space<vmem>>, %arg5: memref<4x1xf32, #tpu.memory_space<vmem>>, %arg6: memref<1x4x256xf32, #tpu.memory_space<vmem>>) attributes {dimension_semantics = [#tpu.dimension_semantics<parallel>], iteration_bounds = array<i64: 2>, scalar_prefetch = 0 : i64, scratch_operands = 0 : i64, tpu.core_type = #tpu.core_type<tc>, window_params = [{transform_indices = @transform_0, window_bounds = array<i64: 1, 4, 256>}, {pipeline_mode = #tpu.pipeline_mode<synchronous>, transform_indices = @transform_1, window_bounds = array<i64: 4, 2>}, {pipeline_mode = #tpu.pipeline_mode<synchronous>, transform_indices = @transform_2, window_bounds = array<i64: 1, 2>}, {pipeline_mode = #tpu.pipeline_mode<synchronous>, transform_indices = @transform_3, window_bounds = array<i64: 4, 2>}, {pipeline_mode = #tpu.pipeline_mode<synchronous>, transform_indices = @transform_4, window_bounds = array<i64: 4, 1>}, {transform_indices = @transform_5, window_bounds = array<i64: 1, 4, 256>}]} {
    %c0 = arith.constant 0 : index
    %c0_0 = arith.constant 0 : index
    %c0_1 = arith.constant 0 : index
    %0 = vector.load %arg1[%c0, %c0_0, %c0_1] : memref<1x4x256xf32, #tpu.memory_space<vmem>>, vector<1x4x256xf32>
    %1 = vector.shape_cast %0 : vector<1x4x256xf32> to vector<4x256xf32>
    %cst = arith.constant dense<0.000000e+00> : vector<4xf32>
    %2 = vector.multi_reduction <add>, %1, %cst [1] : vector<4x256xf32> to vector<4xf32>
    %3 = vector.shape_cast %2 : vector<4xf32> to vector<4x1xf32>
    %cst_2 = arith.constant 2.560000e+02 : f32
    %4 = vector.broadcast %cst_2 : f32 to vector<4x1xf32>
    %5 = arith.divf %3, %4 : vector<4x1xf32>
    %c0_3 = arith.constant 0 : index
    %c0_4 = arith.constant 0 : index
    %6 = vector.load %arg2[%c0_3, %c0_4] : memref<4x2xf32, #tpu.memory_space<vmem>>, vector<4x2xf32>
    %7 = vector.broadcast %5 : vector<4x1xf32> to vector<4x2xf32>
    %8 = arith.mulf %6, %7 : vector<4x2xf32>
    %cst_5 = arith.constant dense<0.000000e+00> : vector<2xf32>
    %9 = vector.multi_reduction <add>, %8, %cst_5 [0] : vector<4x2xf32> to vector<2xf32>
    %10 = vector.shape_cast %9 : vector<2xf32> to vector<1x2xf32>
    %c0_6 = arith.constant 0 : index
    %c0_7 = arith.constant 0 : index
    %11 = vector.load %arg3[%c0_6, %c0_7] : memref<1x2xf32, #tpu.memory_space<vmem>>, vector<1x2xf32>
    %12 = arith.addf %10, %11 : vector<1x2xf32>
    %cst_8 = arith.constant 0.000000e+00 : f32
    %13 = vector.broadcast %cst_8 : f32 to vector<1x2xf32>
    %14 = arith.maximumf %12, %13 : vector<1x2xf32>
    %c0_9 = arith.constant 0 : index
    %c0_10 = arith.constant 0 : index
    %15 = vector.load %arg4[%c0_9, %c0_10] : memref<4x2xf32, #tpu.memory_space<vmem>>, vector<4x2xf32>
    %16 = vector.broadcast %14 : vector<1x2xf32> to vector<4x2xf32>
    %17 = arith.mulf %15, %16 : vector<4x2xf32>
    %cst_11 = arith.constant dense<0.000000e+00> : vector<4xf32>
    %18 = vector.multi_reduction <add>, %17, %cst_11 [1] : vector<4x2xf32> to vector<4xf32>
    %19 = vector.shape_cast %18 : vector<4xf32> to vector<4x1xf32>
    %c0_12 = arith.constant 0 : index
    %c0_13 = arith.constant 0 : index
    %20 = vector.load %arg5[%c0_12, %c0_13] : memref<4x1xf32, #tpu.memory_space<vmem>>, vector<4x1xf32>
    %21 = arith.addf %19, %20 : vector<4x1xf32>
    %cst_14 = arith.constant 0.000000e+00 : f32
    %22 = vector.broadcast %cst_14 : f32 to vector<4x1xf32>
    %23 = arith.subf %22, %21 : vector<4x1xf32>
    %24 = math.exp %23 : vector<4x1xf32>
    %cst_15 = arith.constant 1.000000e+00 : f32
    %25 = vector.broadcast %cst_15 : f32 to vector<4x1xf32>
    %26 = arith.addf %25, %24 : vector<4x1xf32>
    %cst_16 = arith.constant 1.000000e+00 : f32
    %27 = vector.broadcast %cst_16 : f32 to vector<4x1xf32>
    %28 = arith.divf %27, %26 : vector<4x1xf32>
    %29 = vector.broadcast %28 : vector<4x1xf32> to vector<4x256xf32>
    %30 = arith.mulf %1, %29 : vector<4x256xf32>
    %c0_17 = arith.constant 0 : index
    %c0_18 = arith.constant 0 : index
    %c0_19 = arith.constant 0 : index
    %31 = vector.load %arg6[%c0_17, %c0_18, %c0_19] : memref<1x4x256xf32, #tpu.memory_space<vmem>>, vector<1x4x256xf32>
    %32 = vector.shape_cast %31 : vector<1x4x256xf32> to vector<4x256xf32>
    %33 = vector.shape_cast %30 : vector<4x256xf32> to vector<1x4x256xf32>
    tpu.vector_store %arg6[%c0_17, %c0_18, %c0_19], %33 {strides = array<i32>} : memref<1x4x256xf32, #tpu.memory_space<vmem>>, vector<1x4x256xf32>,
    return
  }
  func.func @transform_0(%arg0: i32) -> (i32, i32, i32) {
    %c0_i32 = arith.constant 0 : i32
    %c0_i32_0 = arith.constant 0 : i32
    %c0_i32_1 = arith.constant 0 : i32
    return %arg0, %c0_i32, %c0_i32_0 : i32, i32, i32
  }
  func.func @transform_1(%arg0: i32) -> (i32, i32) {
    %c0_i32 = arith.constant 0 : i32
    %c0_i32_0 = arith.constant 0 : i32
    %c0_i32_1 = arith.constant 0 : i32
    return %c0_i32, %c0_i32_0 : i32, i32
  }
  func.func @transform_2(%arg0: i32) -> (i32, i32) {
    %c0_i32 = arith.constant 0 : i32
    %c0_i32_0 = arith.constant 0 : i32
    %c0_i32_1 = arith.constant 0 : i32
    return %c0_i32, %c0_i32_0 : i32, i32
  }
  func.func @transform_3(%arg0: i32) -> (i32, i32) {
    %c0_i32 = arith.constant 0 : i32
    %c0_i32_0 = arith.constant 0 : i32
    %c0_i32_1 = arith.constant 0 : i32
    return %c0_i32, %c0_i32_0 : i32, i32
  }
  func.func @transform_4(%arg0: i32) -> (i32, i32) {
    %c0_i32 = arith.constant 0 : i32
    %c0_i32_0 = arith.constant 0 : i32
    %c0_i32_1 = arith.constant 0 : i32
    return %c0_i32, %c0_i32_0 : i32, i32
  }
  func.func @transform_5(%arg0: i32) -> (i32, i32, i32) {
    %c0_i32 = arith.constant 0 : i32
    %c0_i32_0 = arith.constant 0 : i32
    %c0_i32_1 = arith.constant 0 : i32
    return %arg0, %c0_i32, %c0_i32_0 : i32, i32, i32
  }
}

</mosaic_0001>

<bundles_post_ra>
// kernel: tpu_custom_call.1
= control target key start
LH: loop header
LB: loop body
LE: loop exit
PB: predicated region body
PF: predicated region fallthrough
CT: control target
= control target key end

     0   :  { %10 = vsyncpa [#allocation3], 0  ;;  %s626_s0 = inlined_call_operand.vmem [shape: f32[2,4,256], index: 0, kind: input, shape index: {}]   ;;  %s627_s1 = inlined_call_operand.vmem [shape: f32[4,2], index: 1, kind: input, shape index: {}]   ;;  %s628_s2 = inlined_call_operand.vmem [shape: f32[1,2], index: 2, kind: input, shape index: {}]   ;;  %s629_s3 = inlined_call_operand.vmem [shape: f32[4,2], index: 3, kind: input, shape index: {}]   ;;  %s630_s4 = inlined_call_operand.vmem [shape: f32[4,1], index: 4, kind: input, shape index: {}]   ;;  %s631_s5 = inlined_call_operand.hbm [shape: f32[2,4,256], index: 5, kind: output, shape index: {}]  }
   0x1   :  { %12 = vsyncpa [#allocation3 + $0x1], 0  ;;  %s512_s18 = smov 0   ;;  %s514_s19 = smov 0  }
   0x2   :  { %s516_s20 = smov 0   ;;  %s518_s21 = smov 0  }
   0x3 LB: > { %s533_s22 = sadd.s32 4294967295, %s477_s21   ;;  %s353_s23 = sadd.s32 4294967294, %s477_s21   ;;  %s477_s21 = sphi %s518_s21, %s637_s21   ;;  %s473_s20 = sphi %s516_s20, %s636_s20   ;;  %s469_s19 = sphi %s514_s19, %s635_s19   ;;  %s465_s18 = sphi %s512_s18, %s634_s18  }
   0x4   : > { %s537_s24 = sadd.s32 1, %s477_s21   ;;  %s135_s25 = sadd.s32 1, %s473_s20 }
   0x5   : > { %s132_s26 = ssub.s32 %s477_s21, %s537_s24  ;;  %p145_p0 = scmp.ne.s32.totalorder %s473_s20, %s469_s19 }
   0x6   : > { %p133_p1 = scmp.eq.s32.totalorder %s132_s26, 0  ;;  %p146_p2 = scmp.eq.s32.totalorder %s533_s22, 1 }
   0x7   : > { %p151_p3 = scmp.ne.s32.totalorder %s469_s19, %s465_s18  ;;  %p152_p4 = scmp.eq.s32.totalorder %s353_s23, 1 }
   0x8   : > { %s548_s27 = scalar_select %p133_p1, %s473_s20, %s135_s25  }
   0x9   : > { %p550_p5 = por %p146_p2, %p145_p0  ;;  %p554_p6 = por %p152_p4, %p151_p3 }
   0xa   : > { %p356_p7 = scmp.ge.s32.totalorder %s477_s21, 1  ;;  %p190_p8 = scmp.lt.s32.totalorder %s477_s21, 3 }
   0xc   : > { %p191_p9 = pnand %p356_p7, %p190_p8 }
   0xd   : > { %p218_p10 = scmp.lt.s32.totalorder (!%p191_p9), %s533_s22, 1  ;;  %vm227_vm0 = vcmask (!%p191_p9), 1043456   ;;  %v235_v5 = vld [vmem:[%s627_s1] sm:$0xf] (!%p191_p9)  ;;  %vm237_vm1 = vcmask (!%p191_p9), 11264   ;;  %v249_v13 = vlaneseq (!%p191_p9)  ;;  %v479_v26 = vmov (!%p191_p9), 0  }
   0xe   : > { %194 = sbr.rel (%p191_p9) target bundleno = 517 (0x205), region = 40  ;;  %v245_v17 = vld [vmem:[%s628_s2] sm:$0x1] (!%p191_p9)  ;;  %408 = vset.pattern.permute.xlu1 (!%p191_p9), %v479_v26  ;;  %409 = vset.pattern.permute.xlu0 (!%p191_p9), %v479_v26  ;;  %v480_v35 = vmov (!%p191_p9), 839922192   ;;  %s215_s23 = sand.u32 (!%p191_p9), 1, %s469_s19  }
   0xf   : > { %v250_v16 = vshrl.u32 (!%p191_p9), %v249_v13, 7  ;;  %v248_v22 = vld [vmem:[%s629_s3] sm:$0xf] (!%p191_p9)  ;;  %v270_v36 = vunpack.c.l.s4 (!%p191_p9), %v480_v35  ;;  %s357_s25 = sshll.u32 (!%p191_p9), %s215_s23, 3  ;;  %s366_s26 = sshll.u32 (!%p191_p9), %s533_s22, 7 }
  0x10   : > { %v257_v27 = vld [vmem:[%s630_s4] sm:$0xf] (!%p191_p9)  ;;  %s280_s10 = scalar_lea.sflag (!%p191_p9), [#allocation3], %s215_s23 }
  0x11   : > { %v251_v20 = vsub.s32 (!%p191_p9), 0, %v250_v16  ;;  %v271_v37 = vunpack.c.0.s8 (!%p191_p9), %v270_v36 }
  0x13   : > { %v274_v38 = vsub.s32 (!%p191_p9), %v271_v37, %v250_v16 }
  0x15   : > { %s219_s30 = scalar_select %p218_p10, %s533_s22, 1 }
  0x16   : > { %s481_s22 = smov [#allocation2]  }
  0x17   : > { %s365_s6 = sshll.u32 %s219_s30, 3  ;;  %s217_s30 = scalar_lea.vmem [#allocation2], %s357_s25 }
  0x18   : > { %s222_s9 = scalar_lea.vmem %s626_s0, %s365_s6  ;;  %s294_s6 = sshll.u32 %s217_s30, 4  ;;  %s586_s6 = int_to_ptr.vmem [resolvable:$true] %s294_s6 }
  0x19   : > { %v223_v0 = vld [vmem:[%s222_s9] sm:$0xff]  ;;  %s584_s9 = scalar_lea.hbm %s631_s5, %s366_s26  ;;  %s415_s11 = scalar_lea.vmem %s586_s6, 128 }
  0x1a   : > { %v225_v1 = vcombine.high %v223_v0, %v223_v0  ;;  %v228_v2 = vsel %vm227_vm0, %v223_v0, 0.0  ;;  %p416_p11 = scmp.ne.s32.totalorder %s586_s6, %s415_s11  ;;  %s419_s12 = sshll.u32 %s481_s22, 4  ;;  %s420_s12 = int_to_ptr.vmem [resolvable:$false] %s419_s12 }
  0x1b   : > { %s421_s13 = scalar_lea.vmem %s420_s12, 256  ;;  %p422_p0 = scmp.lt.s32.totalorder %s586_s6, %s420_s12 }
  0x1c   : > { %v229_v3 = vsel %vm227_vm0, %v225_v1, 0.0  ;;  %p417_p12 = pnand %p416_p11, %p550_p5  ;;  %p423_p1 = scmp.lt.s32.totalorder %s421_s13, %s415_s11 }
  0x1d   : > { %v230_v4 = vadd.f32 %v229_v3, %v228_v2 }
  0x1e   : > { %p418_p13 = pneg %p417_p12  ;;  %p424_p2 = por %p423_p1, %p422_p0 }
  0x1f   : > { %231 = vadd.xlane.f32.xlu0 %v230_v4 }
  0x20   : > { %p425_p3 = pnand %p424_p2, %p418_p13 }
  0xac   : > { %v232_v6 = vpop.xlane.xlu0 %231 }
  0xad   : > { %v234_v7 = vmul.f32 0.00390625, %v232_v6 }
  0xaf   : > { %v236_v8 = vmul.f32 %v235_v5, %v234_v7 }
  0xb1   : > { %v238_v9 = vsel %vm237_vm1, %v236_v8, 0.0 }
  0xb2   : > { %v239_v10 = vrot.slane %v238_v9, 4 }
  0xb4   : > { %v240_v11 = vadd.f32 %v239_v10, %v238_v9 }
  0xb6   : > { %v241_v12 = vrot.slane %v240_v11, 2 }
  0xb8   : > { %v242_v14 = vadd.f32 %v241_v12, %v240_v11 }
  0xba   : > { %v243_v15 = vrot.slane %v242_v14, 1 }
  0xbc   : > { %v244_v18 = vadd.f32 %v243_v15, %v242_v14 }
  0xbe   : > { %v246_v19 = vadd.f32 %v245_v17, %v244_v18 }
  0xc0   : > { %v247_v21 = vmax.f32 %v246_v19, 0.0 }
  0xc2   : > { %v252_v23 = vrot.slane %v247_v21, %v251_v20 }
  0xc4   : > { %v253_v24 = vmul.f32 %v252_v23, %v248_v22 }
  0xc6   : > { %v254_v25 = vsel %vm237_vm1, %v253_v24, 0.0 }
  0xc7   : > { %255 = vadd.xlane.f32.xlu0 %v254_v25 }
 0x154   : > { %v256_v28 = vpop.xlane.xlu0 %255 }
 0x155   : > { %v258_v29 = vadd.f32 %v257_v27, %v256_v28 }
 0x157   : > { %v259_v30 = vsub.f32 0.0, %v258_v29 }
 0x159   : > { %v260_v31 = vmul.f32 1.442695, %v259_v30 }
 0x15b   : > { %411 = vpow2.f32 %v260_v31 }
 0x165   : > { %v412_v32 = vpop.eup %411 }
 0x166   : > { %v262_v33 = vadd.f32 1.0, %v412_v32 }
 0x168   : > { %413 = vrcp.f32 %v262_v33 }
 0x172   : > { %v414_v34 = vpop.eup %413 }
 0x173   : > { %267 = vperm.xlu1 %408, %v414_v34  }
 0x1f2   : > { %v268_v39 = vpop.permute.xlu1 %267 }
 0x1f3   : > { %v275_v40 = vrot.slane %v268_v39, %v274_v38 }
 0x1f5   : > { %v277_v41 = vmul.f32 %v275_v40, %v223_v0 }
 0x1f7   : > { %278 = vst [vmem:[%s217_s30] sm:$0xff] %v277_v41 }
 0x1f8   : > { %428 = shalt.err (!%p425_p3)
}
 0x1f9   : > { %s429_s14 = scalar_lea.hbm %s584_s9, 128  ;;  %s433_s17 = scalar_lea.hbm %s631_s5, 256 }
 0x1fa   : > { %p430_p4 = scmp.ne.s32.totalorder %s584_s9, %s429_s14  ;;  %p434_p9 = scmp.lt.u32.totalorder %s584_s9, %s631_s5 }
 0x1fb   : > { %p435_p10 = scmp.lt.u32.totalorder %s433_s17, %s429_s14  ;;  %p437_p12 = scmp.lt.u32.totalorder %s429_s14, %s584_s9 }
 0x1fc   : > { %p431_p7 = pnand %p430_p4, %p550_p5 }
 0x1fd   : > { %p436_p11 = por %p435_p10, %p434_p9 }
 0x1fe   : > { %p432_p8 = pneg %p431_p7 }
 0x1ff   : > { %p438_p13 = por %p437_p12, %p436_p11 }
 0x201   : > { %p439_p0 = pnand %p438_p13, %p432_p8 }
 0x203   : > { %442 = shalt.err (!%p439_p0)
}
 0x204   : > { %367 = dma.vmem_to_hbm [thread:$0]  (%p550_p5), %s586_s6, 128, %s584_s9, %s280_s10  }
 0x205 PF: > { %p373_p1 = scmp.ge.s32.totalorder %s477_s21, 2  ;;  %s306_s26 = sand.u32 1, %s465_s18  }
 0x206   : > { %s307_s30 = scalar_lea.sflag [#allocation3], %s306_s26 }
 0x207   : > { %p370_p2 = pnand %p373_p1, %p554_p6 }
 0x209   : > { %460 = dma.done.wait (!%p370_p2), %s307_s30, 128  }
 0x20a   : > { %462 = vsyncadd (!%p370_p2), %s307_s30, 4294967168  ;;  %p15_p3 = scmp.ge.s32.totalorder %s537_s24, 4   ;;  %s634_s18 = smov %s469_s19 }
 0x20b   : > { %s635_s19 = smov %s473_s20  ;;  %s636_s20 = smov %s548_s27 }
 0x20c   : > { %s637_s21 = smov %s537_s24  ;;  %17 = sbr.rel (!%p15_p3) target bundleno = 3 (0x3), region = 75 }
 0x213   :  { %312 = vsyncpa [#allocation3], 1 }
 0x214   :  { %314 = vsyncpa [#allocation3 + $0x1], 1 }

</bundles_post_ra>
